<compile_context>
chip_gen: v7x
topology: tpu7x:2x2x1
jax: 0.10.0
libtpu: 0.0.40
codegen_flags: <defaults>
</compile_context>

<pallas_src>
import jax
import jax.numpy as jnp
from jax.experimental import pallas as pl
from jax.experimental.pallas import tpu as pltpu

# ---------------- model dims (small, consistent with the module) -------------
MIDI_WIDTH = 128          # midi_width / midi_out_width / hidden_dims[0]
LATENT_DIM = 32
MASK_Y_WIDTH = 25         # maskinput width (latent_dim + 25 feeds decoder)
SEQ = 25                  # decoder reshapes to (-1, 25, 128)
N_SONGS = 2
BATCH = N_SONGS * SEQ     # 50
BN_EPS = 1e-5

# packed-weight row offsets inside w_big (all multiples of 16 -> bf16 tile aligned)
OFF_ABS = 0                                   # Wabs          rows   0:128
OFF_D2 = MIDI_WIDTH                           # Wd2           rows 128:256
OFF_D1Z = 2 * MIDI_WIDTH                      # Wd1 (z part)  rows 256:288
OFF_MUVAR = 2 * MIDI_WIDTH + LATENT_DIM       # [Wmu|Wvar|0]  rows 288:416
W_BIG_ROWS = OFF_MUVAR + MIDI_WIDTH           # 416


# ------------------------------- kernel --------------------------------------
def _make_vae_kernel(b_valid, b_pad, has_y, has_mask):
    inv_n = 1.0 / float(b_valid)
    needs_row_mask = b_pad != b_valid

    def kernel(*refs):
        it = iter(refs)
        x_ref = next(it)                               # (Bp,128)  bf16
        noise_ref = next(it)                           # (Bp,32)   f32
        y_ref = next(it) if has_y else None            # (Bp,25)   bf16
        keep_ref = next(it) if has_mask else None      # (Bp,128)  bf16 (1 - mask)
        w_ref = next(it)                               # (416,128) bf16 packed weights
        w_d1y_ref = next(it) if has_y else None        # (25,128)  bf16
        bias_ref = next(it)                            # (8,128)   f32
        out_ref = next(it)                             # (Bp,128)  f32

        # --- encoder: absolute_input Linear(128 -> 128), bf16 MXU / f32 acc.
        #     b_abs intentionally NOT added: it cancels under training-mode BN. ---
        h = jnp.dot(x_ref[...], w_ref[OFF_ABS:OFF_ABS + MIDI_WIDTH, :],
                    preferred_element_type=jnp.float32)

        # --- BatchNorm1d(128): training-mode stats over VALID rows only,
        #     folded into a single scale/shift, var via E[h^2] - mean^2 ---
        if needs_row_mask:
            row = jax.lax.broadcasted_iota(jnp.int32, (b_pad, 1), 0)
            hv = jnp.where(row < b_valid, h, 0.0)      # stats-only mask
        else:
            hv = h
        mean = jnp.sum(hv, axis=0, keepdims=True) * inv_n
        mean_sq = jnp.sum(hv * hv, axis=0, keepdims=True) * inv_n
        var = mean_sq - mean * mean
        scale = bias_ref[0:1, :] * jax.lax.rsqrt(var + BN_EPS)   # gamma * rsqrt(var+eps)
        shift = bias_ref[1:2, :] - mean * scale                  # beta - mean*scale
        h = h * scale + shift

        # --- F.leaky_relu (negative_slope = 0.01) via max (mul+max, no select) ---
        h = jnp.maximum(h, 0.01 * h)
        # (no padded-row re-mask: dead rows only feed dead output rows)

        # --- fc_mu | fc_var fused into ONE matmul against the padded (128,128)
        #     slab of w_big; bias row 4 is [b_mu | b_var | zeros]. ---
        hb = h.astype(jnp.bfloat16)
        mv = jnp.dot(hb, w_ref[OFF_MUVAR:OFF_MUVAR + MIDI_WIDTH, :],
                     preferred_element_type=jnp.float32)
        mv = mv + bias_ref[4:5, :]
        mu = mv[:, :LATENT_DIM]
        sigma = jnp.exp(mv[:, LATENT_DIM:2 * LATENT_DIM])   # sigma = exp(fc_var(h))
        z = mu + sigma * noise_ref[...]                      # reparameterisation

        # --- decoder_input: Linear(L+25 -> 128) + Tanh.
        #     cat([z,y]) @ W^T == z @ Wz + y @ Wy; y-term skipped statically when
        #     maskinput is None (module default is zeros). ---
        d = jnp.dot(z.astype(jnp.bfloat16), w_ref[OFF_D1Z:OFF_D1Z + LATENT_DIM, :],
                    preferred_element_type=jnp.float32)
        d = d + bias_ref[2:3, :]                             # b_d1
        if has_y:
            d = d + jnp.dot(y_ref[...], w_d1y_ref[...],
                            preferred_element_type=jnp.float32)
        d = jnp.tanh(d)

        # --- decoder_output: Linear(128 -> 128) + Sigmoid ---
        o = jnp.dot(d.astype(jnp.bfloat16), w_ref[OFF_D2:OFF_D2 + MIDI_WIDTH, :],
                    preferred_element_type=jnp.float32)
        o = jax.nn.sigmoid(o + bias_ref[3:4, :])             # b_d2

        # --- masked_fill(out, masks.bool(), 0) as a multiply by keep=(1-mask);
        #     skipped statically if masks is None ---
        if has_mask:
            o = o * keep_ref[...]
        out_ref[...] = o

    return kernel


# ------------------------------ wrapper ---------------------------------------
def _pad_rows(a, b_pad):
    pad = b_pad - a.shape[0]
    return a if pad == 0 else jnp.pad(a, ((0, pad), (0, 0)))


@jax.jit
def gaussian_vae_forward(x, noise, params, maskinput=None, masks=None):
    """x:(B,128) f32; noise:(B,32) f32; maskinput:(B,25)|None; masks:(B//25,25,128)|None."""
    b = x.shape[0]
    b_pad = max(16, ((b + 15) // 16) * 16)   # sublane- and bf16-pack-aligned M (50 -> 64)
    has_y = maskinput is not None
    has_mask = masks is not None

    ins = [
        _pad_rows(x.astype(jnp.bfloat16), b_pad),      # matmul-only operand -> bf16
        _pad_rows(noise.astype(jnp.float32), b_pad),   # reparam stays f32
    ]
    if has_y:
        ins.append(_pad_rows(maskinput.astype(jnp.bfloat16), b_pad))
    if has_mask:
        keep = 1.0 - masks.reshape(b, MIDI_WIDTH).astype(jnp.float32)
        ins.append(_pad_rows(keep.astype(jnp.bfloat16), b_pad))
    ins.append(params["w_big"])
    if has_y:
        ins.append(params["w_d1y"])
    ins.append(params["bias_pack"])

    vmem = pl.BlockSpec(memory_space=pltpu.MemorySpace.VMEM)
    out = pl.pallas_call(
        _make_vae_kernel(b, b_pad, has_y, has_mask),
        out_shape=jax.ShapeDtypeStruct((b_pad, MIDI_WIDTH), jnp.float32),
        in_specs=[vmem] * len(ins),
        out_specs=vmem,
        cost_estimate=pl.CostEstimate(flops=7_000_000,
                                      transcendentals=20_000,
                                      bytes_accessed=180_000),
        # no vmem_limit override: footprint < 1 MiB, default scoped VMEM is plenty
    )(*ins)
    return out[:b].reshape(-1, SEQ, MIDI_WIDTH)        # mimics z.view(-1, 25, 128)


# --------------------------- deterministic init --------------------------------
def _linear(key, fan_in, fan_out):
    """PyTorch-style uniform(-1/sqrt(fan_in), 1/sqrt(fan_in)); W stored as (in, out)."""
    kw, kb = jax.random.split(key)
    bound = 1.0 / jnp.sqrt(jnp.float32(fan_in))
    w = jax.random.uniform(kw, (fan_in, fan_out), jnp.float32, -bound, bound)
    b = jax.random.uniform(kb, (fan_out,), jnp.float32, -bound, bound)
    return w, b


def init_params(key):
    keys = jax.random.split(key, 5)
    w_abs, _b_abs = _linear(keys[0], MIDI_WIDTH, MIDI_WIDTH)              # absolute_input
    w_mu, b_mu = _linear(keys[1], MIDI_WIDTH, LATENT_DIM)                 # fc_mu
    w_var, b_var = _linear(keys[2], MIDI_WIDTH, LATENT_DIM)               # fc_var
    w_d1, b_d1 = _linear(keys[3], LATENT_DIM + MASK_Y_WIDTH, MIDI_WIDTH)  # decoder_input
    w_d2, b_d2 = _linear(keys[4], MIDI_WIDTH, MIDI_WIDTH)                 # decoder_output

    gamma = jnp.ones((MIDI_WIDTH,), jnp.float32)                          # BatchNorm affine
    beta = jnp.zeros((MIDI_WIDTH,), jnp.float32)

    # One packed (8,128) f32 bias/affine array (b_abs dropped — cancels under BN):
    #  row 0: bn_gamma, 1: bn_beta, 2: b_d1, 3: b_d2,
    #  row 4: [b_mu | b_var | zero-pad], rows 5-7: zero padding to 8 sublanes.
    muvar_b = jnp.pad(jnp.concatenate([b_mu, b_var]), (0, MIDI_WIDTH - 2 * LATENT_DIM))
    zrow = jnp.zeros((MIDI_WIDTH,), jnp.float32)
    bias_pack = jnp.stack([gamma, beta, b_d1, b_d2, muvar_b, zrow, zrow, zrow])

    # Single packed bf16 weight slab (416,128):
    #  rows   0:128 = Wabs, 128:256 = Wd2, 256:288 = Wd1 (z part),
    #  rows 288:416 = [Wmu | Wvar | zero-pad] (128 in-features, padded to 128 cols).
    w_muvar = jnp.pad(jnp.concatenate([w_mu, w_var], axis=1),
                      ((0, 0), (0, MIDI_WIDTH - 2 * LATENT_DIM)))         # (128,128)
    w_big = jnp.concatenate([w_abs, w_d2, w_d1[:LATENT_DIM], w_muvar],
                            axis=0).astype(jnp.bfloat16)                  # (416,128)
    w_d1y = w_d1[LATENT_DIM:].astype(jnp.bfloat16)                        # (25,128)

    return {"w_big": w_big, "w_d1y": w_d1y, "bias_pack": bias_pack}


# ---------------------------------- main ---------------------------------------
if __name__ == "__main__":
    root = jax.random.PRNGKey(0)
    k_param, k_x, k_noise, k_mask = jax.random.split(root, 4)

    params = init_params(k_param)

    # encoder input: B rows of 128 midi features (flatten(start_dim=1) is identity)
    x = jax.random.uniform(k_x, (BATCH, MIDI_WIDTH), jnp.float32)
    # reparameterisation noise N(0,1), drawn deterministically outside the kernel
    noise = jax.random.normal(k_noise, (BATCH, LATENT_DIM), jnp.float32)
    # masks kwarg: ~10% positions masked
    masks = (jax.random.uniform(k_mask, (N_SONGS, SEQ, MIDI_WIDTH)) < 0.1).astype(jnp.int8)
    # maskinput kwarg left at its default (zeros) -> specialized fast path (no y matmul)

    out = gaussian_vae_forward(x, noise, params, maskinput=None, masks=masks)
    out = jax.block_until_ready(out)

    assert out.shape == (N_SONGS, SEQ, MIDI_WIDTH), out.shape
    assert bool(jnp.all(jnp.isfinite(out)))
    assert bool(jnp.all((out >= 0.0) & (out <= 1.0)))              # sigmoid range
    assert bool(jnp.all(jnp.where(masks != 0, out == 0.0, True)))  # masked_fill honored
    print("KERNEL_OK")
</pallas_src>

<mosaic_0001>
module attributes {stable_mosaic.version = 11 : i64} {
  func.func @kernel(%arg0: memref<64x128xbf16, #tpu.memory_space<vmem>>, %arg1: memref<64x32xf32, #tpu.memory_space<vmem>>, %arg2: memref<64x128xbf16, #tpu.memory_space<vmem>>, %arg3: memref<416x128xbf16, #tpu.memory_space<vmem>>, %arg4: memref<8x128xf32, #tpu.memory_space<vmem>>, %arg5: memref<64x128xf32, #tpu.memory_space<vmem>>) attributes {dimension_semantics = [], scalar_prefetch = 0 : i64, scratch_operands = 0 : i64, tpu.core_type = #tpu.core_type<tc>} {
    %c0 = arith.constant 0 : index
    %c0_0 = arith.constant 0 : index
    %0 = vector.load %arg0[%c0, %c0_0] : memref<64x128xbf16, #tpu.memory_space<vmem>>, vector<64x128xbf16>
    %c0_1 = arith.constant 0 : index
    %c0_2 = arith.constant 0 : index
    %1 = vector.load %arg3[%c0_1, %c0_2] : memref<416x128xbf16, #tpu.memory_space<vmem>>, vector<128x128xbf16>
    %cst = arith.constant dense<0.000000e+00> : vector<64x128xf32>
    %2 = tpu.matmul %0, %1, %cst {dimension_numbers = #tpu.dot_dimension_numbers<[1], [0], [0], [1], [0, 0, 1, 1], [], []>} : vector<64x128xbf16>, vector<128x128xbf16>, vector<64x128xf32> -> vector<64x128xf32>
    %3 = tpu.iota {dimensions = array<i32: 0>} : vector<64x1xi32>
    %c50_i32 = arith.constant 50 : i32
    %4 = vector.broadcast %c50_i32 : i32 to vector<64x1xi32>
    %5 = arith.cmpi slt, %3, %4 : vector<64x1xi32>
    %cst_3 = arith.constant 0.000000e+00 : f32
    %6 = vector.shape_cast %5 : vector<64x1xi1> to vector<64x1xi1>
    %7 = vector.broadcast %6 : vector<64x1xi1> to vector<64x128xi1>
    %8 = vector.broadcast %cst_3 : f32 to vector<64x128xf32>
    %9 = arith.select %7, %2, %8 : vector<64x128xi1>, vector<64x128xf32>
    %cst_4 = arith.constant dense<0.000000e+00> : vector<128xf32>
    %10 = vector.multi_reduction <add>, %9, %cst_4 [0] : vector<64x128xf32> to vector<128xf32>
    %11 = vector.shape_cast %10 : vector<128xf32> to vector<1x128xf32>
    %cst_5 = arith.constant 2.000000e-02 : f32
    %12 = vector.broadcast %cst_5 : f32 to vector<1x128xf32>
    %13 = arith.mulf %11, %12 : vector<1x128xf32>
    %14 = arith.mulf %9, %9 : vector<64x128xf32>
    %cst_6 = arith.constant dense<0.000000e+00> : vector<128xf32>
    %15 = vector.multi_reduction <add>, %14, %cst_6 [0] : vector<64x128xf32> to vector<128xf32>
    %16 = vector.shape_cast %15 : vector<128xf32> to vector<1x128xf32>
    %cst_7 = arith.constant 2.000000e-02 : f32
    %17 = vector.broadcast %cst_7 : f32 to vector<1x128xf32>
    %18 = arith.mulf %16, %17 : vector<1x128xf32>
    %19 = arith.mulf %13, %13 : vector<1x128xf32>
    %20 = arith.subf %18, %19 : vector<1x128xf32>
    %c0_8 = arith.constant 0 : index
    %c0_9 = arith.constant 0 : index
    %21 = vector.load %arg4[%c0_8, %c0_9] : memref<8x128xf32, #tpu.memory_space<vmem>>, vector<1x128xf32>
    %cst_10 = arith.constant 9.99999974E-6 : f32
    %22 = vector.broadcast %cst_10 : f32 to vector<1x128xf32>
    %23 = arith.addf %20, %22 : vector<1x128xf32>
    %24 = math.rsqrt %23 : vector<1x128xf32>
    %25 = arith.mulf %21, %24 : vector<1x128xf32>
    %c1 = arith.constant 1 : index
    %c0_11 = arith.constant 0 : index
    %26 = vector.load %arg4[%c1, %c0_11] : memref<8x128xf32, #tpu.memory_space<vmem>>, vector<1x128xf32>
    %27 = arith.mulf %13, %25 : vector<1x128xf32>
    %28 = arith.subf %26, %27 : vector<1x128xf32>
    %29 = vector.broadcast %25 : vector<1x128xf32> to vector<64x128xf32>
    %30 = arith.mulf %2, %29 : vector<64x128xf32>
    %31 = vector.broadcast %28 : vector<1x128xf32> to vector<64x128xf32>
    %32 = arith.addf %30, %31 : vector<64x128xf32>
    %cst_12 = arith.constant 0.00999999977 : f32
    %33 = vector.broadcast %cst_12 : f32 to vector<64x128xf32>
    %34 = arith.mulf %33, %32 : vector<64x128xf32>
    %35 = arith.maximumf %32, %34 : vector<64x128xf32>
    %36 = arith.truncf %35 : vector<64x128xf32> to vector<64x128xbf16>
    %c288 = arith.constant 288 : index
    %c0_13 = arith.constant 0 : index
    %37 = vector.load %arg3[%c288, %c0_13] : memref<416x128xbf16, #tpu.memory_space<vmem>>, vector<128x128xbf16>
    %cst_14 = arith.constant dense<0.000000e+00> : vector<64x128xf32>
    %38 = tpu.matmul %36, %37, %cst_14 {dimension_numbers = #tpu.dot_dimension_numbers<[1], [0], [0], [1], [0, 0, 1, 1], [], []>} : vector<64x128xbf16>, vector<128x128xbf16>, vector<64x128xf32> -> vector<64x128xf32>
    %c4 = arith.constant 4 : index
    %c0_15 = arith.constant 0 : index
    %39 = vector.load %arg4[%c4, %c0_15] : memref<8x128xf32, #tpu.memory_space<vmem>>, vector<1x128xf32>
    %40 = vector.broadcast %39 : vector<1x128xf32> to vector<64x128xf32>
    %41 = arith.addf %38, %40 : vector<64x128xf32>
    %42 = vector.extract_strided_slice %41 {offsets = [0, 0], sizes = [64, 32], strides = [1, 1]} : vector<64x128xf32> to vector<64x32xf32>
    %43 = vector.extract_strided_slice %41 {offsets = [0, 32], sizes = [64, 32], strides = [1, 1]} : vector<64x128xf32> to vector<64x32xf32>
    %44 = math.exp %43 : vector<64x32xf32>
    %c0_16 = arith.constant 0 : index
    %c0_17 = arith.constant 0 : index
    %45 = vector.load %arg1[%c0_16, %c0_17] : memref<64x32xf32, #tpu.memory_space<vmem>>, vector<64x32xf32>
    %46 = arith.mulf %44, %45 : vector<64x32xf32>
    %47 = arith.addf %42, %46 : vector<64x32xf32>
    %48 = arith.truncf %47 : vector<64x32xf32> to vector<64x32xbf16>
    %c256 = arith.constant 256 : index
    %c0_18 = arith.constant 0 : index
    %49 = vector.load %arg3[%c256, %c0_18] : memref<416x128xbf16, #tpu.memory_space<vmem>>, vector<32x128xbf16>
    %cst_19 = arith.constant dense<0.000000e+00> : vector<64x128xf32>
    %50 = tpu.matmul %48, %49, %cst_19 {dimension_numbers = #tpu.dot_dimension_numbers<[1], [0], [0], [1], [0, 0, 1, 1], [], []>} : vector<64x32xbf16>, vector<32x128xbf16>, vector<64x128xf32> -> vector<64x128xf32>
    %c2 = arith.constant 2 : index
    %c0_20 = arith.constant 0 : index
    %51 = vector.load %arg4[%c2, %c0_20] : memref<8x128xf32, #tpu.memory_space<vmem>>, vector<1x128xf32>
    %52 = vector.broadcast %51 : vector<1x128xf32> to vector<64x128xf32>
    %53 = arith.addf %50, %52 : vector<64x128xf32>
    %54 = math.tanh %53 : vector<64x128xf32>
    %55 = arith.truncf %54 : vector<64x128xf32> to vector<64x128xbf16>
    %c128 = arith.constant 128 : index
    %c0_21 = arith.constant 0 : index
    %56 = vector.load %arg3[%c128, %c0_21] : memref<416x128xbf16, #tpu.memory_space<vmem>>, vector<128x128xbf16>
    %cst_22 = arith.constant dense<0.000000e+00> : vector<64x128xf32>
    %57 = tpu.matmul %55, %56, %cst_22 {dimension_numbers = #tpu.dot_dimension_numbers<[1], [0], [0], [1], [0, 0, 1, 1], [], []>} : vector<64x128xbf16>, vector<128x128xbf16>, vector<64x128xf32> -> vector<64x128xf32>
    %c3 = arith.constant 3 : index
    %c0_23 = arith.constant 0 : index
    %58 = vector.load %arg4[%c3, %c0_23] : memref<8x128xf32, #tpu.memory_space<vmem>>, vector<1x128xf32>
    %59 = vector.broadcast %58 : vector<1x128xf32> to vector<64x128xf32>
    %60 = arith.addf %57, %59 : vector<64x128xf32>
    %61 = arith.negf %60 : vector<64x128xf32>
    %62 = math.exp %61 : vector<64x128xf32>
    %cst_24 = arith.constant 1.000000e+00 : f32
    %63 = vector.broadcast %cst_24 : f32 to vector<64x128xf32>
    %64 = arith.addf %63, %62 : vector<64x128xf32>
    %65 = arith.divf %63, %64 : vector<64x128xf32>
    %c0_25 = arith.constant 0 : index
    %c0_26 = arith.constant 0 : index
    %66 = vector.load %arg2[%c0_25, %c0_26] : memref<64x128xbf16, #tpu.memory_space<vmem>>, vector<64x128xbf16>
    %67 = arith.extf %66 : vector<64x128xbf16> to vector<64x128xf32>
    %68 = arith.mulf %65, %67 : vector<64x128xf32>
    %c0_27 = arith.constant 0 : index
    %c0_28 = arith.constant 0 : index
    %69 = vector.load %arg5[%c0_27, %c0_28] : memref<64x128xf32, #tpu.memory_space<vmem>>, vector<64x128xf32>
    tpu.vector_store %arg5[%c0_27, %c0_28], %68 {strides = array<i32>} : memref<64x128xf32, #tpu.memory_space<vmem>>, vector<64x128xf32>,
    return
  }
}

</mosaic_0001>

<bundles_post_ra>
// kernel: gaussian_vae_forward.1
= control target key start
LH: loop header
LB: loop body
LE: loop exit
PB: predicated region body
PF: predicated region fallthrough
CT: control target
= control target key end

     0   :  { %s1171_s11 = smov 32   ;;  %v182_v28 = vlaneseq  ;;  %s1172_s7 = smov 96   ;;  %vm575_vm1 = vcmask 261120   ;;  %s1412_s3 = inlined_call_operand.vmem [shape: bf16[416,128], index: 3, kind: input, shape index: {}]   ;;  %s1413_s0 = inlined_call_operand.vmem [shape: bf16[64,128], index: 0, kind: input, shape index: {}]   ;;  %s1414_s1 = inlined_call_operand.vmem [shape: f32[64,32], index: 1, kind: input, shape index: {}]   ;;  %s1415_s4 = inlined_call_operand.vmem [shape: f32[8,128], index: 4, kind: input, shape index: {}]   ;;  %s1416_s2 = inlined_call_operand.vmem [shape: bf16[64,128], index: 2, kind: input, shape index: {}]   ;;  %s1417_s5 = inlined_call_operand.vmem [shape: f32[64,128], index: 5, kind: output, shape index: {}]  }
   0x1   :  { %v1075_v0 = vld [vmem:[%s1412_s3] sm:$0xff]   ;;  %v1076_v1 = vld [vmem:[%s1412_s3 + $0x8] sm:$0xff]   ;;  %v1077_v2 = vld [vmem:[%s1412_s3 + $0x10] sm:$0xff]  }
   0x2   :  { %989 = vmatprep.subr.bf16.mxu0 %v1075_v0  ;;  %v1078_v3 = vld [vmem:[%s1412_s3 + $0x18] sm:$0xff]   ;;  %v1083_v4 = vld [vmem:[%s1413_s0] sm:$0xff]   ;;  %v1080_v6 = vld [vmem:[%s1412_s3 + $0x28] sm:$0xff]   ;;  %v1287_v30 = vshrl.u32 %v182_v28, 7 }
   0x3   :  { %990 = vmatpush3.bf16.msra.mxu0 %v1075_v0  ;;  %1005 = vmatprep.mubr.bf16.mxu0 %v1083_v4  ;;  %v1079_v5 = vld [vmem:[%s1412_s3 + $0x20] sm:$0xff]   ;;  %v1081_v7 = vld [vmem:[%s1412_s3 + $0x30] sm:$0xff]   ;;  %v1082_v8 = vld [vmem:[%s1412_s3 + $0x38] sm:$0xff]  }
   0x4   :  { %991 = vmatprep.subr.bf16.mxu0 %v1076_v1  ;;  %v1084_v9 = vld [vmem:[%s1413_s0 + $0x8] sm:$0xff]   ;;  %v1085_v10 = vld [vmem:[%s1413_s0 + $0x10] sm:$0xff]   ;;  %v1086_v11 = vld [vmem:[%s1413_s0 + $0x18] sm:$0xff]   ;;  %v189_v37 = vadd.s32 48, %v1287_v30 }
   0x5   :  { %v1087_v12 = vld [vmem:[%s1412_s3 + $0x90] sm:$0xff]   ;;  %v1088_v13 = vld [vmem:[%s1412_s3 + $0x98] sm:$0xff]   ;;  %v1089_v14 = vld [vmem:[%s1412_s3 + $0xa0] sm:$0xff]  }
   0x6   :  { %1013 = vmatprep.subr.bf16.mxu1 %v1087_v12  ;;  %v1090_v15 = vld [vmem:[%s1412_s3 + $0xa8] sm:$0xff]   ;;  %v1091_v16 = vld [vmem:[%s1412_s3 + $0xb0] sm:$0xff]   ;;  %v1092_v17 = vld [vmem:[%s1412_s3 + $0xb8] sm:$0xff]   ;;  %vm197_vm0 = vcmp.lt.s32.totalorder %v189_v37, 50 }
   0x7   :  { %992 = vmatpush3.bf16.msra.mxu0 %v1076_v1  ;;  %1014 = vmatpush3.bf16.msra.mxu1 %v1087_v12  ;;  %v1093_v18 = vld [vmem:[%s1412_s3 + $0xc0] sm:$0xff]   ;;  %v1094_v19 = vld [vmem:[%s1412_s3 + $0xc8] sm:$0xff]   ;;  %v464_v21 = vld [vmem:[%s1414_s1 + $0x10] sm:$0xff] }
   0x8   :  { %993 = vmatprep.subr.bf16.mxu0 %v1077_v2  ;;  %1015 = vmatprep.subr.bf16.mxu1 %v1088_v13  ;;  %v462_v20 = vld [vmem:[%s1414_s1] sm:$0xff]  ;;  %v463_v22 = vld [vmem:[%s1414_s1 + $0x8] sm:$0xff]  ;;  %v465_v23 = vld [vmem:[%s1414_s1 + $0x18] sm:$0xff] }
   0x9   :  { %478 = vrot.lane.b32.xlu0 %v462_v20, %s1171_s11  ;;  %482 = vrot.lane.b32.xlu1 %v464_v21, %s1171_s11  ;;  %v466_v24 = vld [vmem:[%s1414_s1 + $0x20] sm:$0xff]  ;;  %v467_v25 = vld [vmem:[%s1414_s1 + $0x28] sm:$0xff] }
   0xa   :  { %v468_v26 = vld [vmem:[%s1414_s1 + $0x30] sm:$0xff]  ;;  %v469_v27 = vld [vmem:[%s1414_s1 + $0x38] sm:$0xff]  ;;  %v261_v12 = vld [vmem:[%s1415_s4] sm:$0x1] }
   0xb   :  { %994 = vmatpush3.bf16.msra.mxu0 %v1077_v2  ;;  %1016 = vmatpush3.bf16.msra.mxu1 %v1088_v13  ;;  %v270_v13 = vsub.s32 0, %v1287_v30 }
   0xc   :  { %995 = vmatprep.subr.bf16.mxu0 %v1078_v3  ;;  %1017 = vmatprep.subr.bf16.mxu1 %v1089_v14 }
   0xd   :  { %480 = vrot.lane.b32.xlu0 %v463_v22, %s1171_s11  ;;  %484 = vrot.lane.b32.xlu1 %v465_v23, %s1171_s11 }
   0xf   :  { %996 = vmatpush3.bf16.msra.mxu0 %v1078_v3  ;;  %1018 = vmatpush3.bf16.msra.mxu1 %v1089_v14 }
  0x10   :  { %997 = vmatprep.subr.bf16.mxu0 %v1079_v5  ;;  %1019 = vmatprep.subr.bf16.mxu1 %v1090_v15 }
  0x11   :  { %486 = vrot.lane.b32.xlu0 %v466_v24, %s1171_s11  ;;  %488 = vrot.lane.b32.xlu1 %v467_v25, %s1171_s11 }
  0x13   :  { %998 = vmatpush3.bf16.msra.mxu0 %v1079_v5  ;;  %1020 = vmatpush3.bf16.msra.mxu1 %v1090_v15 }
  0x14   :  { %999 = vmatprep.subr.bf16.mxu0 %v1080_v6  ;;  %1021 = vmatprep.subr.bf16.mxu1 %v1091_v16 }
  0x15   :  { %490 = vrot.lane.b32.xlu0 %v468_v26, %s1171_s11  ;;  %492 = vrot.lane.b32.xlu1 %v469_v27, %s1171_s11 }
  0x17   :  { %1000 = vmatpush3.bf16.msra.mxu0 %v1080_v6  ;;  %1022 = vmatpush3.bf16.msra.mxu1 %v1091_v16  ;;  %v265_v16 = vld [vmem:[%s1415_s4 + $0x1] sm:$0x1] }
  0x18   :  { %1001 = vmatprep.subr.bf16.mxu0 %v1081_v7  ;;  %1023 = vmatprep.subr.bf16.mxu1 %v1092_v17 }
  0x1b   :  { %1002 = vmatpush3.bf16.msra.mxu0 %v1081_v7  ;;  %1024 = vmatpush3.bf16.msra.mxu1 %v1092_v17 }
  0x1c   :  { %1003 = vmatprep.subr.bf16.mxu0 %v1082_v8  ;;  %1025 = vmatprep.subr.bf16.mxu1 %v1093_v18 }
  0x1f   :  { %1004 = vmatpush3.bf16.msra.mxu0 %v1082_v8  ;;  %1026 = vmatpush3.bf16.msra.mxu1 %v1093_v18 }
  0x20   :  { %1027 = vmatprep.subr.bf16.mxu1 %v1094_v19 }
  0x22   :  { %1006 = vmatmul.mubr.bf16.vlgmr.msra.gmra.mrb[0].mxu0 %v1084_v9 }
  0x23   :  { %1009 = vmatprep.mubr.bf16.mxu0 %v1085_v10  ;;  %1028 = vmatpush3.bf16.msra.mxu1 %v1094_v19 }
  0x2a   :  { %1010 = vmatmul.mubr.bf16.gmra.mrb[4].mxu0 %v1086_v11 }
  0xf5   :  { %v1007_v29 = vpop.f32.mrb[0].mxu0 }
  0xf6   :  { %v151_v31 = vpop.f32.mrb[1].mxu0  ;;  %v239_v38 = vmul.f32 %v1007_v29, %v1007_v29 }
  0xf7   :  { %v1008_v32 = vpop.f32.mrb[2].mxu0  ;;  %v237_v34 = vmul.f32 %v151_v31, %v151_v31 }
  0xf8   :  { %v154_v33 = vpop.f32.mrb[3].mxu0  ;;  %v240_v41 = vmul.f32 %v1008_v32, %v1008_v32 }
  0xf9   :  { %v223_v35 = vadd.f32 %v154_v33, %v151_v31  ;;  %v238_v36 = vmul.f32 %v154_v33, %v154_v33 }
  0xfb   :  { %v224_v39 = vadd.f32 %v1007_v29, %v223_v35  ;;  %v245_v40 = vadd.f32 %v238_v36, %v237_v34 }
  0xfd   :  { %v246_v42 = vadd.f32 %v245_v40, %v239_v38  ;;  %v1011_v43 = vpop.f32.mrb[4].mxu0  ;;  %v225_v44 = vadd.f32 %v1008_v32, %v224_v39 }
  0xfe   :  { %v167_v45 = vpop.f32.mrb[5].mxu0  ;;  %v221_v50 = vsel %vm197_vm0, %v1011_v43, 0.0 }
  0xff   :  { %v226_v46 = vadd.f32 %v225_v44, %v167_v45  ;;  %v241_v47 = vmul.f32 %v167_v45, %v167_v45  ;;  %v247_v48 = vadd.f32 %v246_v42, %v240_v41  ;;  %v1012_v49 = vpop.f32.mrb[6].mxu0  ;;  %v243_v55 = vmul.f32 %v221_v50, %v221_v50 }
 0x100   :  { %v170_v51 = vpop.f32.mrb[7].mxu0 }
 0x101   :  { %v248_v52 = vadd.f32 %v247_v48, %v241_v47  ;;  %v227_v53 = vadd.f32 %v226_v46, %v170_v51  ;;  %v242_v54 = vmul.f32 %v170_v51, %v170_v51 }
 0x103   :  { %v228_v56 = vadd.f32 %v227_v53, %v221_v50  ;;  %v249_v57 = vadd.f32 %v248_v52, %v242_v54 }
 0x105   :  { %v230_v58 = vrot.slane %v228_v56, 4  ;;  %v250_v59 = vadd.f32 %v249_v57, %v243_v55  ;;  %v1095_v57 = vld [vmem:[%s1412_s3 + $0x80] sm:$0xff]  }
 0x106   :  { %1037 = vmatprep.subr.bf16.mxu0 %v1095_v57 }
 0x107   :  { %v231_v60 = vadd.f32 %v230_v58, %v228_v56  ;;  %v252_v61 = vrot.slane %v250_v59, 4  ;;  %1038 = vmatpush3.bf16.msra.mxu0 %v1095_v57  ;;  %v895_v58 = vld [vmem:[%s1415_s4 + $0x4] ss:$0 sm:$0xff] }
 0x109   :  { %v232_v62 = vrot.slane %v231_v60, 2  ;;  %v253_v63 = vadd.f32 %v252_v61, %v250_v59 }
 0x10b   :  { %v233_v0 = vadd.f32 %v232_v62, %v231_v60  ;;  %v254_v1 = vrot.slane %v253_v63, 2 }
 0x10d   :  { %v234_v2 = vrot.slane %v233_v0, 1  ;;  %v255_v3 = vadd.f32 %v254_v1, %v253_v63 }
 0x10f   :  { %v235_v4 = vadd.f32 %v234_v2, %v233_v0  ;;  %v256_v5 = vrot.slane %v255_v3, 1 }
 0x111   :  { %v236_v6 = vmul.f32 0.02, %v235_v4  ;;  %v257_v7 = vadd.f32 %v256_v5, %v255_v3 }
 0x113   :  { %v258_v8 = vmul.f32 0.02, %v257_v7  ;;  %v259_v9 = vmul.f32 %v236_v6, %v236_v6  ;;  %v1096_v7 = vld [vmem:[%s1412_s3 + $0x88] sm:$0xff]  }
 0x114   :  { %1039 = vmatprep.subr.bf16.mxu0 %v1096_v7 }
 0x115   :  { %v260_v10 = vsub.f32 %v258_v8, %v259_v9  ;;  %v479_v9 = vpop.permute.xlu0 %478  ;;  %1040 = vmatpush3.bf16.msra.mxu0 %v1096_v7  ;;  %v1104_v7 = vld [vmem:[%s1412_s3 + $0x78] sm:$0xff]  }
 0x117   :  { %v262_v11 = vadd.f32 1e-05, %v260_v10 }
 0x119   :  { %1105 = vrsqrt.f32 %v262_v11 }
 0x123   :  { %v1106_v14 = vpop.eup %1105 }
 0x124   :  { %v264_v15 = vmul.f32 %v1106_v14, %v261_v12  ;;  %v483_v14 = vpop.permute.xlu1 %482 }
 0x126   :  { %v266_v17 = vmul.f32 %v264_v15, %v236_v6  ;;  %v271_v18 = vrot.slane %v264_v15, %v270_v13 }
 0x128   :  { %v267_v19 = vsub.f32 %v265_v16, %v266_v17  ;;  %v277_v20 = vmul.f32 %v271_v18, %v170_v51  ;;  %v272_v21 = vmul.f32 %v271_v18, %v151_v31  ;;  %v273_v22 = vmul.f32 %v271_v18, %v154_v33 }
 0x129   :  { %v274_v23 = vmul.f32 %v1007_v29, %v271_v18  ;;  %v275_v24 = vmul.f32 %v1008_v32, %v271_v18  ;;  %v276_v25 = vmul.f32 %v271_v18, %v167_v45  ;;  %v278_v26 = vmul.f32 %v1011_v43, %v271_v18 }
 0x12a   :  { %v283_v27 = vrot.slane %v267_v19, %v270_v13  ;;  %v279_v28 = vmul.f32 %v1012_v49, %v271_v18 }
 0x12c   :  { %v289_v34 = vadd.f32 %v283_v27, %v277_v20  ;;  %v284_v30 = vadd.f32 %v283_v27, %v272_v21  ;;  %v285_v35 = vadd.f32 %v283_v27, %v273_v22  ;;  %v286_v36 = vadd.f32 %v283_v27, %v274_v23  ;;  %v481_v22 = vpop.permute.xlu0 %480 }
 0x12d   :  { %v287_v37 = vadd.f32 %v283_v27, %v275_v24  ;;  %v288_v38 = vadd.f32 %v283_v27, %v276_v25  ;;  %v290_v39 = vadd.f32 %v283_v27, %v278_v26  ;;  %v291_v40 = vadd.f32 %v283_v27, %v279_v28  ;;  %v485_v24 = vpop.permute.xlu1 %484 }
 0x12e   :  { %v297_v41 = vmul.f32 0.01, %v289_v34  ;;  %v292_v42 = vmul.f32 0.01, %v284_v30  ;;  %v293_v44 = vmul.f32 0.01, %v285_v35 }
 0x12f   :  { %v294_v46 = vmul.f32 0.01, %v286_v36  ;;  %v295_v31 = vmul.f32 0.01, %v287_v37  ;;  %v296_v33 = vmul.f32 0.01, %v288_v38 }
 0x130   :  { %v300_v29 = vmax.f32 %v284_v30, %v292_v42  ;;  %v301_v32 = vmax.f32 %v285_v35, %v293_v44  ;;  %v305_v45 = vmax.f32 %v289_v34, %v297_v41  ;;  %v298_v43 = vmul.f32 0.01, %v290_v39  ;;  %v487_v30 = vpop.permute.xlu0 %486 }
 0x131   :  { %v302_v47 = vmax.f32 %v286_v36, %v294_v46  ;;  %v303_v48 = vmax.f32 %v287_v37, %v295_v31  ;;  %v304_v49 = vmax.f32 %v288_v38, %v296_v33  ;;  %v299_v50 = vmul.f32 0.01, %v291_v40  ;;  %v489_v36 = vpop.permute.xlu1 %488 }
 0x132   :  { %v308_v51 = vpack.c.bf16 %v301_v32, %v300_v29  ;;  %v306_v52 = vmax.f32 %v290_v39, %v298_v43  ;;  %v1097_v39 = vld [vmem:[%s1412_s3 + $0x40] sm:$0xff]   ;;  %v1099_v32 = vld [vmem:[%s1412_s3 + $0x50] sm:$0xff]  }
 0x133   :  { %v309_v53 = vpack.c.bf16 %v303_v48, %v302_v47  ;;  %v310_v54 = vpack.c.bf16 %v305_v45, %v304_v49  ;;  %v307_v55 = vmax.f32 %v291_v40, %v299_v50  ;;  %v1098_v40 = vld [vmem:[%s1412_s3 + $0x48] sm:$0xff]   ;;  %1049 = vmatprep.subr.bf16.mxu1 %v1097_v39 }
 0x134   :  { %1029 = vmatprep.mubr.bf16.mxu1 %v308_v51  ;;  %v491_v46 = vpop.permute.xlu0 %490 }
 0x135   :  { %1030 = vmatmul.mubr.bf16.vlgmr.msra.gmra.mrb[0].mxu1 %v309_v53  ;;  %v311_v56 = vpack.c.bf16 %v307_v55, %v306_v52  ;;  %v493_v29 = vpop.permute.xlu1 %492 }
 0x136   :  { %1033 = vmatprep.mubr.bf16.mxu1 %v310_v54  ;;  %1050 = vmatpush3.bf16.msra.mxu1 %v1097_v39 }
 0x137   :  { %1051 = vmatprep.subr.bf16.mxu1 %v1098_v40 }
 0x13a   :  { %1052 = vmatpush3.bf16.msra.mxu1 %v1098_v40 }
 0x13b   :  { %1053 = vmatprep.subr.bf16.mxu1 %v1099_v32 }
 0x13d   :  { %1034 = vmatmul.mubr.bf16.gmra.mrb[4].mxu1 %v311_v56 }
 0x13e   :  { %1054 = vmatpush3.bf16.msra.mxu1 %v1099_v32 }
 0x208   :  { %v1031_v59 = vpop.f32.mrb[0].mxu1 }
 0x209   :  { %v1303_v60 = vadd.f32 %v1031_v59, %v895_v58  ;;  %v415_v61 = vpop.f32.mrb[1].mxu1 }
 0x20a   :  { %v1305_v62 = vadd.f32 %v895_v58, %v415_v61  ;;  %v1032_v63 = vpop.f32.mrb[2].mxu1 }
 0x20b   :  { %v450_v0 = vmul.f32 1.442695, %v1303_v60  ;;  %v1308_v1 = vadd.f32 %v1032_v63, %v895_v58  ;;  %v418_v2 = vpop.f32.mrb[3].mxu1 }
 0x20c   :  { %v446_v3 = vmul.f32 1.442695, %v1305_v62  ;;  %v1311_v4 = vadd.f32 %v895_v58, %v418_v2 }
 0x20d   :  { %v452_v5 = vmul.f32 1.442695, %v1308_v1 }
 0x20e   :  { %1107 = vpow2.f32 %v446_v3  ;;  %v448_v6 = vmul.f32 1.442695, %v1311_v4 }
 0x20f   :  { %1109 = vpow2.f32 %v450_v0 }
 0x210   :  { %1111 = vpow2.f32 %v448_v6  ;;  %v1035_v8 = vpop.f32.mrb[4].mxu1  ;;  %v1103_v6 = vld [vmem:[%s1412_s3 + $0x70] sm:$0xff]  }
 0x211   :  { %v1318_v10 = vadd.f32 %v1035_v8, %v895_v58  ;;  %v431_v11 = vpop.f32.mrb[5].mxu1  ;;  %1113 = vpow2.f32 %v452_v5  ;;  %v1102_v5 = vld [vmem:[%s1412_s3 + $0x68] sm:$0xff]   ;;  %v904_v8 = vld [vmem:[%s1415_s4 + $0x2] ss:$0 sm:$0xff] }
 0x212   :  { %v1320_v12 = vadd.f32 %v895_v58, %v431_v11  ;;  %v1036_v13 = vpop.f32.mrb[6].mxu1 }
 0x213   :  { %v458_v15 = vmul.f32 1.442695, %v1318_v10  ;;  %v1323_v16 = vadd.f32 %v1036_v13, %v895_v58  ;;  %v434_v17 = vpop.f32.mrb[7].mxu1 }
 0x214   :  { %v454_v18 = vmul.f32 1.442695, %v1320_v12  ;;  %v435_v19 = vadd.f32 %v895_v58, %v434_v17 }
 0x215   :  { %v460_v20 = vmul.f32 1.442695, %v1323_v16 }
 0x216   :  { %1115 = vpow2.f32 %v454_v18  ;;  %v456_v21 = vmul.f32 1.442695, %v435_v19 }
 0x217   :  { %1117 = vpow2.f32 %v458_v15 }
 0x218   :  { %v1108_v23 = vpop.eup %1107  ;;  %1119 = vpow2.f32 %v456_v21 }
 0x219   :  { %v1110_v25 = vpop.eup %1109  ;;  %v502_v26 = vmul.f32 %v1108_v23, %v479_v9  ;;  %1121 = vpow2.f32 %v460_v20 }
 0x21a   :  { %v1112_v27 = vpop.eup %1111  ;;  %v504_v35 = vmul.f32 %v1110_v25, %v483_v14 }
 0x21b   :  { %v503_v28 = vmul.f32 %v1112_v27, %v481_v22  ;;  %518 = vrot.lane.b32.xlu0 %v502_v26, %s1172_s7  ;;  %v1114_v34 = vpop.eup %1113 }
 0x21c   :  { %v505_v37 = vmul.f32 %v1114_v34, %v485_v24 }
 0x21d   :  { %520 = vrot.lane.b32.xlu1 %v503_v28, %s1172_s7 }
 0x21f   :  { %522 = vrot.lane.b32.xlu0 %v504_v35, %s1172_s7 }
 0x220   :  { %v1116_v38 = vpop.eup %1115 }
 0x221   :  { %v1118_v41 = vpop.eup %1117  ;;  %v506_v42 = vmul.f32 %v1116_v38, %v487_v30  ;;  %524 = vrot.lane.b32.xlu1 %v505_v37, %s1172_s7 }
 0x222   :  { %v1120_v44 = vpop.eup %1119  ;;  %v508_v45 = vmul.f32 %v1118_v41, %v491_v46  ;;  %v911_v41 = vld [vmem:[%s1415_s4 + $0x3] ss:$0 sm:$0xff] }
 0x223   :  { %v507_v31 = vmul.f32 %v1120_v44, %v489_v36  ;;  %526 = vrot.lane.b32.xlu0 %v506_v42, %s1172_s7  ;;  %v1122_v33 = vpop.eup %1121 }
 0x224   :  { %v509_v43 = vmul.f32 %v1122_v33, %v493_v29 }
 0x225   :  { %528 = vrot.lane.b32.xlu1 %v507_v31, %s1172_s7 }
 0x227   :  { %530 = vrot.lane.b32.xlu0 %v508_v45, %s1172_s7 }
 0x229   :  { %532 = vrot.lane.b32.xlu1 %v509_v43, %s1172_s7 }
 0x28d   :  { %v519_v47 = vpop.permute.xlu0 %518 }
 0x28e   :  { %v542_v49 = vadd.f32 %v519_v47, %v1305_v62 }
 0x28f   :  { %v521_v48 = vpop.permute.xlu1 %520 }
 0x290   :  { %v543_v50 = vadd.f32 %v521_v48, %v1311_v4  ;;  %v1101_v4 = vld [vmem:[%s1412_s3 + $0x60] sm:$0xff]  }
 0x291   :  { %v523_v51 = vpop.permute.xlu0 %522 }
 0x292   :  { %v550_v52 = vpack.c.bf16 %v543_v50, %v542_v49  ;;  %v544_v54 = vadd.f32 %v523_v51, %v1303_v60 }
 0x293   :  { %v525_v53 = vpop.permute.xlu1 %524 }
 0x294   :  { %v545_v55 = vadd.f32 %v525_v53, %v1308_v1  ;;  %1041 = vmatprep.mubr.msk.bf16.mxu0 %vm575_vm1, %v550_v52  ;;  %v1100_v1 = vld [vmem:[%s1412_s3 + $0x58] sm:$0xff]  }
 0x295   :  { %v527_v56 = vpop.permute.xlu0 %526  ;;  %1055 = vmatprep.subr.bf16.mxu1 %v1100_v1 }
 0x296   :  { %v551_v57 = vpack.c.bf16 %v545_v55, %v544_v54  ;;  %v546_v59 = vadd.f32 %v527_v56, %v1320_v12  ;;  %1056 = vmatpush3.bf16.msra.mxu1 %v1100_v1 }
 0x297   :  { %v529_v58 = vpop.permute.xlu1 %528  ;;  %1057 = vmatprep.subr.bf16.mxu1 %v1101_v4 }
 0x298   :  { %v547_v61 = vadd.f32 %v529_v58, %v435_v19  ;;  %1042 = vmatmul.mubr.msk.bf16.vlgmr.msra.gmra.mrb[8].mxu0 %vm575_vm1, %v551_v57 }
 0x299   :  { %v531_v62 = vpop.permute.xlu0 %530 }
 0x29a   :  { %v552_v63 = vpack.c.bf16 %v547_v61, %v546_v59  ;;  %v548_v2 = vadd.f32 %v531_v62, %v1318_v10  ;;  %1058 = vmatpush3.bf16.msra.mxu1 %v1101_v4 }
 0x29b   :  { %v533_v0 = vpop.permute.xlu1 %532  ;;  %1059 = vmatprep.subr.bf16.mxu1 %v1102_v5 }
 0x29c   :  { %v549_v3 = vadd.f32 %v533_v0, %v1323_v16  ;;  %1045 = vmatprep.mubr.msk.bf16.mxu0 %vm575_vm1, %v552_v63 }
 0x29e   :  { %v553_v60 = vpack.c.bf16 %v549_v3, %v548_v2  ;;  %1060 = vmatpush3.bf16.msra.mxu1 %v1102_v5 }
 0x29f   :  { %1061 = vmatprep.subr.bf16.mxu1 %v1103_v6 }
 0x2a0   :  { %1046 = vmatmul.mubr.msk.bf16.gmra.mrb[12].mxu0 %vm575_vm1, %v553_v60 }
 0x2a2   :  { %1062 = vmatpush3.bf16.msra.mxu1 %v1103_v6  ;;  %v944_v6 = vld [vmem:[%s1416_s2 + $0x8] sm:$0xff]  }
 0x2a3   :  { %1063 = vmatprep.subr.bf16.mxu1 %v1104_v7 }
 0x2a6   :  { %1064 = vmatpush3.bf16.msra.mxu1 %v1104_v7 }
 0x36b   :  { %v1043_v9 = vpop.f32.mrb[8].mxu0 }
 0x36c   :  { %v631_v10 = vadd.f32 %v1043_v9, %v904_v8  ;;  %v622_v11 = vpop.f32.mrb[9].mxu0 }
 0x36d   :  { %v623_v12 = vadd.f32 %v904_v8, %v622_v11  ;;  %v1044_v13 = vpop.f32.mrb[10].mxu0 }
 0x36e   :  { %1123 = vtanh.f32 %v631_v10  ;;  %v634_v14 = vadd.f32 %v1044_v13, %v904_v8  ;;  %v625_v15 = vpop.f32.mrb[11].mxu0 }
 0x36f   :  { %1125 = vtanh.f32 %v623_v12  ;;  %v626_v16 = vadd.f32 %v904_v8, %v625_v15  ;;  %v934_v12 = vunpack.c.l.bf16 %v944_v6 }
 0x370   :  { %1127 = vtanh.f32 %v634_v14 }
 0x371   :  { %1129 = vtanh.f32 %v626_v16 }
 0x373   :  { %v1047_v17 = vpop.f32.mrb[12].mxu0 }
 0x374   :  { %v647_v18 = vadd.f32 %v1047_v17, %v904_v8  ;;  %v638_v19 = vpop.f32.mrb[13].mxu0  ;;  %v935_v17 = vunpack.c.h.bf16 %v944_v6 }
 0x375   :  { %v639_v20 = vadd.f32 %v904_v8, %v638_v19  ;;  %v1048_v21 = vpop.f32.mrb[14].mxu0 }
 0x376   :  { %1131 = vtanh.f32 %v647_v18  ;;  %v650_v22 = vadd.f32 %v1048_v21, %v904_v8  ;;  %v641_v23 = vpop.f32.mrb[15].mxu0 }
 0x377   :  { %1133 = vtanh.f32 %v639_v20  ;;  %v642_v24 = vadd.f32 %v904_v8, %v641_v23  ;;  %v929_v8 = vld [vmem:[%s1416_s2] sm:$0xff]  }
 0x378   :  { %v1124_v25 = vpop.eup %1123  ;;  %1135 = vtanh.f32 %v650_v22  ;;  %v930_v15 = vunpack.c.l.bf16 %v929_v8  ;;  %v931_v20 = vunpack.c.h.bf16 %v929_v8 }
 0x379   :  { %v1126_v26 = vpop.eup %1125  ;;  %1137 = vtanh.f32 %v642_v24 }
 0x37a   :  { %v1128_v27 = vpop.eup %1127 }
 0x37b   :  { %v1130_v28 = vpop.eup %1129  ;;  %v662_v34 = vpack.c.bf16 %v1128_v27, %v1124_v25  ;;  %v946_v25 = vld [vmem:[%s1416_s2 + $0x18] sm:$0xff]  }
 0x37c   :  { %v661_v30 = vpack.c.bf16 %v1130_v28, %v1126_v26  ;;  %v945_v28 = vld [vmem:[%s1416_s2 + $0x10] sm:$0xff]  }
 0x37e   :  { %1065 = vmatprep.mubr.bf16.mxu1 %v661_v30  ;;  %v942_v30 = vunpack.c.l.bf16 %v946_v25 }
 0x37f   :  { %1066 = vmatmul.mubr.bf16.vlgmr.msra.gmra.mrb[8].mxu1 %v662_v34 }
 0x380   :  { %v1132_v35 = vpop.eup %1131 }
 0x381   :  { %v1134_v36 = vpop.eup %1133 }
 0x382   :  { %v1136_v37 = vpop.eup %1135 }
 0x383   :  { %v1138_v38 = vpop.eup %1137  ;;  %v664_v39 = vpack.c.bf16 %v1136_v37, %v1132_v35  ;;  %v938_v35 = vunpack.c.l.bf16 %v945_v28 }
 0x384   :  { %v663_v40 = vpack.c.bf16 %v1138_v38, %v1134_v36  ;;  %v943_v36 = vunpack.c.h.bf16 %v946_v25  ;;  %v939_v38 = vunpack.c.h.bf16 %v945_v28 }
 0x386   :  { %1069 = vmatprep.mubr.bf16.mxu1 %v663_v40 }
 0x387   :  { %1070 = vmatmul.mubr.bf16.gmra.mrb[12].mxu1 %v664_v39 }
 0x452   :  { %v1067_v42 = vpop.f32.mrb[8].mxu1 }
 0x453   :  { %v777_v44 = vadd.f32 %v1067_v42, %v911_v41  ;;  %v768_v46 = vpop.f32.mrb[9].mxu1 }
 0x454   :  { %v769_v31 = vadd.f32 %v911_v41, %v768_v46  ;;  %v1068_v33 = vpop.f32.mrb[10].mxu1 }
 0x455   :  { %v922_v29 = vmul.f32 -1.442695, %v777_v44  ;;  %v780_v32 = vadd.f32 %v1068_v33, %v911_v41  ;;  %v771_v45 = vpop.f32.mrb[11].mxu1 }
 0x456   :  { %v920_v43 = vmul.f32 -1.442695, %v769_v31  ;;  %v772_v47 = vadd.f32 %v911_v41, %v771_v45 }
 0x457   :  { %1139 = vpow2.f32 %v922_v29  ;;  %v923_v48 = vmul.f32 -1.442695, %v780_v32 }
 0x458   :  { %1141 = vpow2.f32 %v920_v43  ;;  %v921_v49 = vmul.f32 -1.442695, %v772_v47 }
 0x459   :  { %1143 = vpow2.f32 %v923_v48 }
 0x45a   :  { %1145 = vpow2.f32 %v921_v49  ;;  %v1071_v50 = vpop.f32.mrb[12].mxu1 }
 0x45b   :  { %v793_v51 = vadd.f32 %v1071_v50, %v911_v41  ;;  %v784_v52 = vpop.f32.mrb[13].mxu1 }
 0x45c   :  { %v785_v53 = vadd.f32 %v911_v41, %v784_v52  ;;  %v1072_v54 = vpop.f32.mrb[14].mxu1 }
 0x45d   :  { %v926_v55 = vmul.f32 -1.442695, %v793_v51  ;;  %v796_v56 = vadd.f32 %v1072_v54, %v911_v41  ;;  %v787_v57 = vpop.f32.mrb[15].mxu1 }
 0x45e   :  { %v924_v58 = vmul.f32 -1.442695, %v785_v53  ;;  %v788_v59 = vadd.f32 %v911_v41, %v787_v57 }
 0x45f   :  { %1147 = vpow2.f32 %v926_v55  ;;  %v927_v61 = vmul.f32 -1.442695, %v796_v56 }
 0x460   :  { %1149 = vpow2.f32 %v924_v58  ;;  %v925_v62 = vmul.f32 -1.442695, %v788_v59 }
 0x461   :  { %v1140_v63 = vpop.eup %1139  ;;  %1151 = vpow2.f32 %v927_v61 }
 0x462   :  { %v1142_v0 = vpop.eup %1141  ;;  %v825_v2 = vadd.f32 1.0, %v1140_v63  ;;  %1153 = vpow2.f32 %v925_v62 }
 0x463   :  { %v1144_v3 = vpop.eup %1143  ;;  %v823_v60 = vadd.f32 1.0, %v1142_v0 }
 0x464   :  { %v1146_v1 = vpop.eup %1145  ;;  %1155 = vrcp.f32 %v825_v2  ;;  %v826_v4 = vadd.f32 1.0, %v1144_v3 }
 0x465   :  { %1157 = vrcp.f32 %v823_v60  ;;  %v824_v5 = vadd.f32 1.0, %v1146_v1 }
 0x466   :  { %1159 = vrcp.f32 %v826_v4 }
 0x467   :  { %1161 = vrcp.f32 %v824_v5 }
 0x469   :  { %v1148_v7 = vpop.eup %1147 }
 0x46a   :  { %v1150_v9 = vpop.eup %1149  ;;  %v829_v10 = vadd.f32 1.0, %v1148_v7 }
 0x46b   :  { %v1152_v11 = vpop.eup %1151  ;;  %v827_v13 = vadd.f32 1.0, %v1150_v9 }
 0x46c   :  { %v1154_v14 = vpop.eup %1153  ;;  %1163 = vrcp.f32 %v829_v10  ;;  %v830_v16 = vadd.f32 1.0, %v1152_v11 }
 0x46d   :  { %1165 = vrcp.f32 %v827_v13  ;;  %v828_v18 = vadd.f32 1.0, %v1154_v14 }
 0x46e   :  { %v1156_v19 = vpop.eup %1155  ;;  %1167 = vrcp.f32 %v830_v16 }
 0x46f   :  { %v1158_v21 = vpop.eup %1157  ;;  %v865_v22 = vmul.f32 %v1156_v19, %v934_v12  ;;  %1169 = vrcp.f32 %v828_v18 }
 0x470   :  { %v1160_v23 = vpop.eup %1159  ;;  %v863_v24 = vmul.f32 %v1158_v21, %v930_v15 }
 0x471   :  { %v1162_v26 = vpop.eup %1161  ;;  %873 = vst [vmem:[%s1417_s5 + $0x10] sm:$0xff] %v865_v22  ;;  %v866_v27 = vmul.f32 %v1160_v23, %v935_v17 }
 0x472   :  { %871 = vst [vmem:[%s1417_s5] sm:$0xff] %v863_v24  ;;  %v864_v34 = vmul.f32 %v1162_v26, %v931_v20 }
 0x473   :  { %874 = vst [vmem:[%s1417_s5 + $0x18] sm:$0xff] %v866_v27 }
 0x474   :  { %872 = vst [vmem:[%s1417_s5 + $0x8] sm:$0xff] %v864_v34 }
 0x476   :  { %v1164_v37 = vpop.eup %1163 }
 0x477   :  { %v1166_v39 = vpop.eup %1165  ;;  %v869_v40 = vmul.f32 %v1164_v37, %v942_v30 }
 0x478   :  { %v1168_v41 = vpop.eup %1167  ;;  %v867_v42 = vmul.f32 %v1166_v39, %v938_v35 }
 0x479   :  { %v1170_v44 = vpop.eup %1169  ;;  %877 = vst [vmem:[%s1417_s5 + $0x30] sm:$0xff] %v869_v40  ;;  %v870_v46 = vmul.f32 %v1168_v41, %v943_v36 }
 0x47a   :  { %875 = vst [vmem:[%s1417_s5 + $0x20] sm:$0xff] %v867_v42  ;;  %v868_v31 = vmul.f32 %v1170_v44, %v939_v38 }
 0x47b   :  { %878 = vst [vmem:[%s1417_s5 + $0x38] sm:$0xff] %v870_v46 }
 0x47c   :  { %876 = vst [vmem:[%s1417_s5 + $0x28] sm:$0xff] %v868_v31 }

</bundles_post_ra>
